<compile_context>
chip_gen: v5e
topology: v5e:2x2
jax: 0.10.0
libtpu: 0.0.40
codegen_flags: <defaults>
</compile_context>

<pallas_src>
import functools

import jax
import jax.numpy as jnp
from jax.experimental import pallas as pl
from jax.experimental.pallas import tpu as pltpu


def _round_up(x, m):
    return ((x + m - 1) // m) * m


def _newton_recip(x):
    """EUP approximate reciprocal + one Newton-Raphson step (~f32 accuracy)."""
    r = pl.reciprocal(x, approx=True)
    return r * (2.0 - x * r)


def fbeta_kernel(x_ref, t_ref, o_ref, *, n_total, tile_n, chunk, num_blocks,
                 beta, smooth):
    c = x_ref.shape[0]
    n_chunks = tile_n // chunk
    a = 1.0 + float(beta) * float(beta)           # (1 + beta^2)
    inv_one_p = 1.0 / (1.0 + float(smooth))       # 1/(sum_c + smooth); sum_c == 1

    def chunk_fbeta(off):
        """Per-row fbeta, shape (1, chunk), for rows [off, off+chunk) of block."""
        x = x_ref[:, off:off + chunk].astype(jnp.float32)     # (C, chunk)
        t = t_ref[:, off:off + chunk]                          # (1, chunk) int32
        # softmax over the class axis (PyTorch dim=1) -> sublane axis here.
        m = jnp.max(x, axis=0, keepdims=True)                  # (1, chunk)
        e = jnp.exp(x - m)                                     # EUP
        s = jnp.sum(e, axis=0, keepdims=True)                  # (1, chunk)
        inv_s = _newton_recip(s)                               # EUP + 2 VALU
        # TP per row = softmax prob of the target class (sublane-iota one-hot).
        onehot = jax.lax.broadcasted_iota(jnp.int32, (c, chunk), 0) == t
        tp = jnp.sum(jnp.where(onehot, e, 0.0), axis=0, keepdims=True) * inv_s
        # sum_c(softmax) == 1 and sum_c(one_hot) == 1  =>  precision == recall.
        p = tp * inv_one_p
        den = a * p + smooth
        return (a * p) * p * _newton_recip(den)                # (1, chunk)

    def block_sum(valid_rows):
        """Sum fbeta over the first `valid_rows` rows; store (1,1,128) partials."""
        acc = jnp.zeros((1, chunk), jnp.float32)
        for k in range(n_chunks):                 # static strip-mine of the block
            off = k * chunk
            if off >= valid_rows:
                break                             # chunk fully past ragged tail
            fb = chunk_fbeta(off)
            if off + chunk > valid_rows:          # tail chunk: constant mask
                lane = jax.lax.broadcasted_iota(jnp.int32, (1, chunk), 1)
                fb = jnp.where(lane < (valid_rows - off), fb, 0.0)
            acc = acc + fb
        # reduce (1, chunk) -> (1, 128) lane partials (cross-lane sum deferred
        # to the wrapper); lane-dense aligned slices are whole-vreg adds.
        part = acc[:, 0:128]
        for k in range(1, chunk // 128):
            part = part + acc[:, k * 128:(k + 1) * 128]
        o_ref[...] = part.reshape(1, 1, 128)

    tail = n_total - (num_blocks - 1) * tile_n    # rows in last block (static)
    if num_blocks == 1:
        block_sum(tail)
    elif tail == tile_n:                          # N divisible by tile_n: no mask
        block_sum(tile_n)
    else:
        i = pl.program_id(0)

        @pl.when(i < num_blocks - 1)
        def _():
            block_sum(tile_n)

        @pl.when(i == num_blocks - 1)
        def _():
            block_sum(tail)


def fbeta_loss(inputs, targets, beta=1.0, smooth=1e-5, tile_n=16384,
               inputs_transposed=False):
    """FBeta loss.

    inputs:  (N, C) float logits (f32 or bf16), or (C, N) if
             inputs_transposed=True (preferred: avoids an extra full-tensor
             HBM transpose pass before this 1-pass, memory-bound kernel).
    targets: (N,) int class ids in [0, C).
    """
    if inputs_transposed:
        c, n = inputs.shape
        x_cn = inputs
    else:
        n, c = inputs.shape
        # TODO(synk): callers should provide (C, N)-major logits (or fuse this
        # transpose into the producer matmul epilogue) to drop this HBM pass.
        x_cn = inputs.T
    t2 = targets.astype(jnp.int32).reshape(1, n)

    # Lane tile: multiple of 128, no larger than needed for small N.
    tile_n = max(128, min(int(tile_n), _round_up(n, 128)))
    tile_n = _round_up(tile_n, 128)

    # VMEM budget (double-buffered logits + labels, sublane padding) kept under
    # ~20 MiB so the kernel also fits v7x's 32 MiB scoped / 64 MiB physical VMEM
    # without needing vmem_limit_bytes overrides.
    def vmem_est(tn):
        c_pad = _round_up(c, 8)
        return 2 * (c_pad + 8) * tn * 4 + 2 * 8 * 128 * 4
    while tile_n > 128 and vmem_est(tile_n) > 20 * 1024 * 1024:
        tile_n = _round_up(max(128, tile_n // 2), 128)
    # TODO(synk): very large class counts (C >> 10k) need a class-split
    # reduction grid; this kernel keeps the whole class axis in one block.

    # Inner strip-mine chunk: largest multiple of 128 <= 1024 dividing tile_n
    # (keeps vreg pressure bounded while the DMA tile stays large).
    if tile_n <= 1024:
        chunk = tile_n
    else:
        chunk = max(cc for cc in range(128, 1025, 128) if tile_n % cc == 0)

    num_blocks = (n + tile_n - 1) // tile_n

    kernel = functools.partial(
        fbeta_kernel, n_total=n, tile_n=tile_n, chunk=chunk,
        num_blocks=num_blocks, beta=float(beta), smooth=float(smooth))

    partials = pl.pallas_call(
        kernel,
        out_shape=jax.ShapeDtypeStruct((num_blocks, 1, 128), jnp.float32),
        grid_spec=pltpu.PrefetchScalarGridSpec(
            num_scalar_prefetch=0,
            grid=(num_blocks,),
            in_specs=[
                pl.BlockSpec((c, tile_n), lambda i: (0, i)),   # logits (C, TN)
                pl.BlockSpec((1, tile_n), lambda i: (0, i)),   # labels (1, TN)
            ],
            out_specs=pl.BlockSpec((1, 1, 128), lambda i: (i, 0, 0)),
        ),
        compiler_params=pltpu.CompilerParams(
            # independent per-block partial sums -> v7x can split blocks
            # across both TensorCores; no-op on single-TC v5e/v6e.
            dimension_semantics=("parallel",),
        ),
    )(x_cn, t2)

    return 1.0 - jnp.sum(partials) / jnp.float32(n)


def fbeta_ref(inputs, targets, beta=1.0, smooth=1e-5):
    """Literal JAX translation of the PyTorch FBetaLoss.forward."""
    p = jax.nn.softmax(inputs.astype(jnp.float32), axis=1)
    onehot = jax.nn.one_hot(targets, inputs.shape[1], dtype=jnp.float32)
    tp = jnp.sum(p * onehot, axis=1)
    precision = tp / (jnp.sum(p, axis=1) + smooth)
    recall = tp / (jnp.sum(onehot, axis=1) + smooth)
    fb = (1.0 + beta ** 2) * precision * recall / (beta ** 2 * precision + recall + smooth)
    return 1.0 - jnp.mean(fb)


if __name__ == "__main__":
    key = jax.random.PRNGKey(0)
    k1, k2, k3, k4 = jax.random.split(key, 4)

    # Case 1: small (N, C) classification problem; N not a multiple of 128.
    N, C = 300, 6
    logits = jax.random.normal(k1, (N, C), dtype=jnp.float32)
    labels = jax.random.randint(k2, (N,), 0, C, dtype=jnp.int32)

    loss = fbeta_loss(logits, labels, beta=1.0, smooth=1e-5)
    jax.block_until_ready(loss)
    ref = fbeta_ref(logits, labels, beta=1.0, smooth=1e-5)
    assert jnp.allclose(loss, ref, atol=1e-5, rtol=1e-5), (float(loss), float(ref))

    # Same problem via the preferred (C, N)-major path (no host transpose pass).
    loss_t = fbeta_loss(logits.T, labels, beta=1.0, smooth=1e-5,
                        inputs_transposed=True)
    jax.block_until_ready(loss_t)
    assert jnp.allclose(loss_t, ref, atol=1e-5, rtol=1e-5), (float(loss_t), float(ref))

    # Case 2: multi-block grid + inner strip-mining + ragged-tail masking.
    N2, C2 = 2500, 6
    logits2 = jax.random.normal(k3, (N2, C2), dtype=jnp.float32)
    labels2 = jax.random.randint(k4, (N2,), 0, C2, dtype=jnp.int32)
    loss2 = fbeta_loss(logits2, labels2, beta=2.0, smooth=1e-5, tile_n=2048)
    jax.block_until_ready(loss2)
    ref2 = fbeta_ref(logits2, labels2, beta=2.0, smooth=1e-5)
    assert jnp.allclose(loss2, ref2, atol=1e-5, rtol=1e-5), (float(loss2), float(ref2))

    print("KERNEL_OK")
</pallas_src>

<mosaic_0001>
module attributes {stable_mosaic.version = 11 : i64} {
  func.func @fbeta_kernel(%arg0: i32, %arg1: memref<6x384xf32, #tpu.memory_space<vmem>>, %arg2: memref<1x384xi32, #tpu.memory_space<vmem>>, %arg3: memref<1x1x128xf32, #tpu.memory_space<vmem>>) attributes {dimension_semantics = [#tpu.dimension_semantics<parallel>], iteration_bounds = array<i64: 1>, scalar_prefetch = 0 : i64, scratch_operands = 0 : i64, tpu.core_type = #tpu.core_type<tc>, window_params = [{transform_indices = @transform_0, window_bounds = array<i64: 6, 384>}, {transform_indices = @transform_1, window_bounds = array<i64: 1, 384>}, {transform_indices = @transform_2, window_bounds = array<i64: 1, 1, 128>}]} {
    %cst = arith.constant 0.000000e+00 : f32
    %0 = vector.broadcast %cst : f32 to vector<1x384xf32>
    %c0 = arith.constant 0 : index
    %c0_0 = arith.constant 0 : index
    %1 = vector.load %arg1[%c0, %c0_0] : memref<6x384xf32, #tpu.memory_space<vmem>>, vector<6x384xf32>
    %c0_1 = arith.constant 0 : index
    %c0_2 = arith.constant 0 : index
    %2 = vector.load %arg2[%c0_1, %c0_2] : memref<1x384xi32, #tpu.memory_space<vmem>>, vector<1x384xi32>
    %cst_3 = arith.constant dense<0xFF800000> : vector<384xf32>
    %3 = vector.multi_reduction <maximumf>, %1, %cst_3 [0] : vector<6x384xf32> to vector<384xf32>
    %4 = vector.shape_cast %3 : vector<384xf32> to vector<1x384xf32>
    %5 = vector.broadcast %4 : vector<1x384xf32> to vector<6x384xf32>
    %6 = arith.subf %1, %5 : vector<6x384xf32>
    %7 = math.exp %6 : vector<6x384xf32>
    %cst_4 = arith.constant dense<0.000000e+00> : vector<384xf32>
    %8 = vector.multi_reduction <add>, %7, %cst_4 [0] : vector<6x384xf32> to vector<384xf32>
    %9 = vector.shape_cast %8 : vector<384xf32> to vector<1x384xf32>
    %10 = tpu.reciprocal %9 {approx = true} : vector<1x384xf32> -> vector<1x384xf32>
    %11 = arith.mulf %9, %10 : vector<1x384xf32>
    %cst_5 = arith.constant 2.000000e+00 : f32
    %12 = vector.broadcast %cst_5 : f32 to vector<1x384xf32>
    %13 = arith.subf %12, %11 : vector<1x384xf32>
    %14 = arith.mulf %10, %13 : vector<1x384xf32>
    %15 = tpu.iota {dimensions = array<i32: 0>} : vector<6x384xi32>
    %16 = vector.broadcast %2 : vector<1x384xi32> to vector<6x384xi32>
    %17 = arith.cmpi eq, %15, %16 : vector<6x384xi32>
    %cst_6 = arith.constant 0.000000e+00 : f32
    %18 = vector.broadcast %cst_6 : f32 to vector<6x384xf32>
    %19 = arith.select %17, %7, %18 : vector<6x384xi1>, vector<6x384xf32>
    %cst_7 = arith.constant dense<0.000000e+00> : vector<384xf32>
    %20 = vector.multi_reduction <add>, %19, %cst_7 [0] : vector<6x384xf32> to vector<384xf32>
    %21 = vector.shape_cast %20 : vector<384xf32> to vector<1x384xf32>
    %22 = arith.mulf %21, %14 : vector<1x384xf32>
    %cst_8 = arith.constant 0.999989986 : f32
    %23 = vector.broadcast %cst_8 : f32 to vector<1x384xf32>
    %24 = arith.mulf %22, %23 : vector<1x384xf32>
    %cst_9 = arith.constant 2.000000e+00 : f32
    %25 = vector.broadcast %cst_9 : f32 to vector<1x384xf32>
    %26 = arith.mulf %25, %24 : vector<1x384xf32>
    %cst_10 = arith.constant 9.99999974E-6 : f32
    %27 = vector.broadcast %cst_10 : f32 to vector<1x384xf32>
    %28 = arith.addf %26, %27 : vector<1x384xf32>
    %cst_11 = arith.constant 2.000000e+00 : f32
    %29 = vector.broadcast %cst_11 : f32 to vector<1x384xf32>
    %30 = arith.mulf %29, %24 : vector<1x384xf32>
    %31 = arith.mulf %30, %24 : vector<1x384xf32>
    %32 = tpu.reciprocal %28 {approx = true} : vector<1x384xf32> -> vector<1x384xf32>
    %33 = arith.mulf %28, %32 : vector<1x384xf32>
    %cst_12 = arith.constant 2.000000e+00 : f32
    %34 = vector.broadcast %cst_12 : f32 to vector<1x384xf32>
    %35 = arith.subf %34, %33 : vector<1x384xf32>
    %36 = arith.mulf %32, %35 : vector<1x384xf32>
    %37 = arith.mulf %31, %36 : vector<1x384xf32>
    %38 = tpu.iota {dimensions = array<i32: 1>} : vector<1x384xi32>
    %c300_i32 = arith.constant 300 : i32
    %39 = vector.broadcast %c300_i32 : i32 to vector<1x384xi32>
    %40 = arith.cmpi slt, %38, %39 : vector<1x384xi32>
    %cst_13 = arith.constant 0.000000e+00 : f32
    %41 = vector.broadcast %cst_13 : f32 to vector<1x384xf32>
    %42 = arith.select %40, %37, %41 : vector<1x384xi1>, vector<1x384xf32>
    %43 = arith.addf %0, %42 : vector<1x384xf32>
    %44 = vector.extract_strided_slice %43 {offsets = [0, 0], sizes = [1, 128], strides = [1, 1]} : vector<1x384xf32> to vector<1x128xf32>
    %45 = vector.extract_strided_slice %43 {offsets = [0, 128], sizes = [1, 128], strides = [1, 1]} : vector<1x384xf32> to vector<1x128xf32>
    %46 = arith.addf %44, %45 : vector<1x128xf32>
    %47 = vector.extract_strided_slice %43 {offsets = [0, 256], sizes = [1, 128], strides = [1, 1]} : vector<1x384xf32> to vector<1x128xf32>
    %48 = arith.addf %46, %47 : vector<1x128xf32>
    %49 = vector.shape_cast %48 : vector<1x128xf32> to vector<1x1x128xf32>
    %c0_14 = arith.constant 0 : index
    %c0_15 = arith.constant 0 : index
    %c0_16 = arith.constant 0 : index
    %50 = vector.load %arg3[%c0_14, %c0_15, %c0_16] : memref<1x1x128xf32, #tpu.memory_space<vmem>>, vector<1x1x128xf32>
    tpu.vector_store %arg3[%c0_14, %c0_15, %c0_16], %49 {strides = array<i32>} : memref<1x1x128xf32, #tpu.memory_space<vmem>>, vector<1x1x128xf32>,
    return
  }
  func.func @transform_0(%arg0: i32) -> (i32, i32) {
    %c0_i32 = arith.constant 0 : i32
    %c0_i32_0 = arith.constant 0 : i32
    return %c0_i32, %arg0 : i32, i32
  }
  func.func @transform_1(%arg0: i32) -> (i32, i32) {
    %c0_i32 = arith.constant 0 : i32
    %c0_i32_0 = arith.constant 0 : i32
    return %c0_i32, %arg0 : i32, i32
  }
  func.func @transform_2(%arg0: i32) -> (i32, i32, i32) {
    %c0_i32 = arith.constant 0 : i32
    %c0_i32_0 = arith.constant 0 : i32
    %c0_i32_1 = arith.constant 0 : i32
    return %arg0, %c0_i32, %c0_i32_0 : i32, i32, i32
  }
}

</mosaic_0001>

<bundles_post_ra>
// kernel: tpu_custom_call.1
= control target key start
LH: loop header
LB: loop body
LE: loop exit
PB: predicated region body
PF: predicated region fallthrough
CT: control target
= control target key end

     0   :  { %7 = vsyncpa [#allocation3], 0  ;;  %s353_s0 = inlined_call_operand.hbm [shape: f32[6,300], index: 0, kind: input, shape index: {}]   ;;  %s354_s1 = inlined_call_operand.hbm [shape: s32[1,300], index: 1, kind: input, shape index: {}]   ;;  %s355_s2 = inlined_call_operand.hbm [shape: f32[1,1,128], index: 2, kind: output, shape index: {}]  }
   0x1   :  { %8 = vsyncpa [#allocation6], 0 }
   0x2   :  { %9 = vsyncpa [#allocation4], 0  ;;  %s15_s11 = sshll.u32 %s353_s0, 4  ;;  %s303_s12 = smov [#allocation2]   ;;  %s16_s11 = int_to_ptr.hbm [resolvable:$true] %s15_s11 }
   0x3   :  { %s17_s13 = sshll.u32 %s303_s12, 4  ;;  %s26_s16 = sshll.u32 %s354_s1, 4  ;;  %s18_s13 = int_to_ptr.vmem [resolvable:$true] %s17_s13  ;;  %s27_s16 = int_to_ptr.hbm [resolvable:$true] %s26_s16 }
   0x4   :  { %20 = dma.hbm_to_vmem [thread:$0]  %s16_s11, 384, %s18_s13, [#allocation3]  }
   0x5   :  { %s304_s17 = smov [#allocation5]  }
   0x6   :  { %s28_s18 = sshll.u32 %s304_s17, 4  ;;  %s29_s18 = int_to_ptr.vmem [resolvable:$true] %s28_s18 }
   0x7   :  { %31 = dma.hbm_to_vmem [thread:$0]  %s27_s16, 48, %s29_s18, [#allocation6]  }
   0x8   :  { %297 = dma.done.wait [#allocation3], 384  }
   0x9   :  { %298 = vsyncadd [#allocation3], 4294966912 }
   0xa   :  { %299 = dma.done.wait [#allocation6], 48  }
   0xb   :  { %300 = vsyncadd [#allocation6], 4294967248  ;;  %vm44_vm0 = vcmask 1045504   ;;  %v40_v0 = vld [vmem:[#allocation2] sm:$0x3f]  ;;  %v108_v27 = vlaneseq  ;;  %s305_s0 = smov [#allocation7]  }
   0xc   :  { %v41_v1 = vld [vmem:[#allocation2 + $0x8] sm:$0x3f]  ;;  %v42_v2 = vld [vmem:[#allocation2 + $0x10] sm:$0x3f]  ;;  %v45_v3 = vsel %vm44_vm0, %v40_v0, -inf  ;;  %s191_s1 = sshll.u32 %s305_s0, 4  ;;  %s192_s1 = int_to_ptr.vmem [resolvable:$true] %s191_s1 }
   0xd   :  { %v52_v4 = vsel %vm44_vm0, %v41_v1, -inf  ;;  %v59_v5 = vsel %vm44_vm0, %v42_v2, -inf  ;;  %v46_v6 = vrot.slane %v45_v3, 4  ;;  %v43_v28 = vld [vmem:[#allocation5] sm:$0x7]  ;;  %v109_v32 = vshrl.u32 %v108_v27, 7 }
   0xe   :  { %v53_v7 = vrot.slane %v52_v4, 4  ;;  %v60_v8 = vrot.slane %v59_v5, 4  ;;  %v110_v33 = vperm.slane %v43_v28, 0  ;;  %v111_v34 = vperm.slane %v43_v28, 1  ;;  %s193_s21 = sshll.u32 %s355_s2, 4  ;;  %s194_s21 = int_to_ptr.hbm [resolvable:$true] %s193_s21 }
   0xf   :  { %v47_v9 = vmax.f32 %v45_v3, %v46_v6  ;;  %v112_v35 = vperm.slane %v43_v28, 2 }
  0x10   :  { %v54_v10 = vmax.f32 %v52_v4, %v53_v7  ;;  %v61_v11 = vmax.f32 %v59_v5, %v60_v8  ;;  %vm113_vm1 = vcmp.eq.s32.totalorder %v109_v32, %v110_v33  ;;  %vm331_vm2 = vcmp.eq.s32.totalorder %v109_v32, %v111_v34 }
  0x11   :  { %v48_v12 = vrot.slane %v47_v9, 2  ;;  %vm335_vm3 = vcmp.eq.s32.totalorder %v109_v32, %v112_v35 }
  0x12   :  { %v55_v13 = vrot.slane %v54_v10, 2  ;;  %v62_v14 = vrot.slane %v61_v11, 2 }
  0x13   :  { %v49_v15 = vmax.f32 %v47_v9, %v48_v12 }
  0x14   :  { %v56_v16 = vmax.f32 %v54_v10, %v55_v13  ;;  %v63_v17 = vmax.f32 %v61_v11, %v62_v14 }
  0x15   :  { %v50_v18 = vrot.slane %v49_v15, 1 }
  0x16   :  { %v57_v19 = vrot.slane %v56_v16, 1  ;;  %v64_v20 = vrot.slane %v63_v17, 1 }
  0x17   :  { %v51_v21 = vmax.f32 %v49_v15, %v50_v18 }
  0x18   :  { %v58_v22 = vmax.f32 %v56_v16, %v57_v19  ;;  %v65_v23 = vmax.f32 %v63_v17, %v64_v20 }
  0x19   :  { %v66_v24 = vsub.f32 %v40_v0, %v51_v21 }
  0x1a   :  { %v67_v25 = vsub.f32 %v41_v1, %v58_v22  ;;  %v68_v26 = vsub.f32 %v42_v2, %v65_v23 }
  0x1b   :  { %v69_v29 = vmul.f32 1.442695, %v66_v24 }
  0x1c   :  { %v71_v30 = vmul.f32 1.442695, %v67_v25  ;;  %v73_v31 = vmul.f32 1.442695, %v68_v26 }
  0x1d   :  { %207 = vpow2.f32 %v69_v29 }
  0x1e   :  { %209 = vpow2.f32 %v71_v30 }
  0x1f   :  { %211 = vpow2.f32 %v73_v31 }
  0x23   :  { %v208_v37 = vpop.eup %207 }
  0x24   :  { %v210_v39 = vpop.eup %209  ;;  %v75_v40 = vsel %vm44_vm0, %v208_v37, 0.0  ;;  %v116_v41 = vsel %vm113_vm1, %v208_v37, 0.0 }
  0x25   :  { %v212_v42 = vpop.eup %211  ;;  %v76_v43 = vrot.slane %v75_v40, 4  ;;  %v82_v44 = vsel %vm44_vm0, %v210_v39, 0.0  ;;  %v117_v45 = vsel %vm331_vm2, %v210_v39, 0.0  ;;  %v119_v46 = vsel %vm44_vm0, %v116_v41, 0.0 }
  0x26   :  { %v83_v47 = vrot.slane %v82_v44, 4  ;;  %v89_v48 = vsel %vm44_vm0, %v212_v42, 0.0  ;;  %v118_v49 = vsel %vm335_vm3, %v212_v42, 0.0  ;;  %v120_v50 = vrot.slane %v119_v46, 4 }
  0x27   :  { %v77_v51 = vadd.f32 %v76_v43, %v75_v40  ;;  %v90_v52 = vrot.slane %v89_v48, 4  ;;  %v126_v53 = vsel %vm44_vm0, %v117_v45, 0.0  ;;  %v133_v54 = vsel %vm44_vm0, %v118_v49, 0.0 }
  0x28   :  { %v84_v55 = vadd.f32 %v83_v47, %v82_v44  ;;  %v127_v56 = vrot.slane %v126_v53, 4  ;;  %v134_v57 = vrot.slane %v133_v54, 4  ;;  %v121_v61 = vadd.f32 %v120_v50, %v119_v46 }
  0x29   :  { %v78_v58 = vrot.slane %v77_v51, 2  ;;  %v91_v59 = vadd.f32 %v90_v52, %v89_v48  ;;  %v171_v48 = vand.u32 127, %v108_v27 }
  0x2a   :  { %v85_v60 = vrot.slane %v84_v55, 2  ;;  %v128_v0 = vadd.f32 %v127_v56, %v126_v53  ;;  %v135_v2 = vadd.f32 %v134_v57, %v133_v54  ;;  %v122_v6 = vrot.slane %v121_v61, 2 }
  0x2b   :  { %v79_v62 = vadd.f32 %v78_v58, %v77_v51  ;;  %v92_v63 = vrot.slane %v91_v59, 2  ;;  %v173_v58 = vadd.s32 256, %v171_v48 }
  0x2c   :  { %v86_v1 = vadd.f32 %v85_v60, %v84_v55  ;;  %v129_v9 = vrot.slane %v128_v0, 2  ;;  %v136_v11 = vrot.slane %v135_v2, 2  ;;  %v123_v13 = vadd.f32 %v122_v6, %v121_v61 }
  0x2d   :  { %v80_v3 = vrot.slane %v79_v62, 1  ;;  %v93_v4 = vadd.f32 %v92_v63, %v91_v59  ;;  %vm176_vm4 = vcmp.lt.s32.totalorder %v173_v58, 300 }
  0x2e   :  { %v87_v5 = vrot.slane %v86_v1, 1  ;;  %v130_v14 = vadd.f32 %v129_v9, %v128_v0  ;;  %v137_v15 = vadd.f32 %v136_v11, %v135_v2  ;;  %v124_v16 = vrot.slane %v123_v13, 1 }
  0x2f   :  { %v81_v7 = vadd.f32 %v80_v3, %v79_v62  ;;  %v94_v8 = vrot.slane %v93_v4, 1 }
  0x30   :  { %v88_v10 = vadd.f32 %v87_v5, %v86_v1  ;;  %v131_v18 = vrot.slane %v130_v14, 1  ;;  %v138_v21 = vrot.slane %v137_v15, 1  ;;  %v125_v26 = vadd.f32 %v124_v16, %v123_v13 }
  0x31   :  { %v95_v12 = vadd.f32 %v94_v8, %v93_v4  ;;  %213 = vrcp.f32 %v81_v7 }
  0x32   :  { %215 = vrcp.f32 %v88_v10  ;;  %v132_v29 = vadd.f32 %v131_v18, %v130_v14  ;;  %v139_v32 = vadd.f32 %v138_v21, %v137_v15 }
  0x33   :  { %217 = vrcp.f32 %v95_v12 }
  0x37   :  { %v214_v17 = vpop.eup %213 }
  0x38   :  { %v216_v19 = vpop.eup %215  ;;  %v99_v20 = vmul.f32 %v214_v17, %v81_v7 }
  0x39   :  { %v218_v22 = vpop.eup %217  ;;  %v100_v23 = vmul.f32 %v216_v19, %v88_v10 }
  0x3a   :  { %v101_v24 = vmul.f32 %v218_v22, %v95_v12  ;;  %v102_v25 = vsub.f32 2.0, %v99_v20 }
  0x3b   :  { %v103_v28 = vsub.f32 2.0, %v100_v23 }
  0x3c   :  { %v104_v30 = vsub.f32 2.0, %v101_v24  ;;  %v105_v31 = vmul.f32 %v214_v17, %v102_v25 }
  0x3d   :  { %v106_v33 = vmul.f32 %v216_v19, %v103_v28 }
  0x3e   :  { %v107_v34 = vmul.f32 %v218_v22, %v104_v30  ;;  %v140_v35 = vmul.f32 %v125_v26, %v105_v31 }
  0x3f   :  { %v141_v36 = vmul.f32 %v132_v29, %v106_v33 }
  0x40   :  { %v142_v37 = vmul.f32 %v139_v32, %v107_v34  ;;  %v143_v38 = vmul.f32 0.99999, %v140_v35 }
  0x41   :  { %v144_v39 = vmul.f32 0.99999, %v141_v36 }
  0x42   :  { %v145_v40 = vmul.f32 0.99999, %v142_v37  ;;  %v146_v41 = vmul.f32 2.0, %v143_v38 }
  0x43   :  { %v147_v42 = vmul.f32 2.0, %v144_v39 }
  0x44   :  { %v148_v43 = vmul.f32 2.0, %v145_v40  ;;  %v149_v44 = vadd.f32 1e-05, %v146_v41  ;;  %v152_v53 = vmul.f32 %v146_v41, %v143_v38 }
  0x45   :  { %v150_v45 = vadd.f32 1e-05, %v147_v42  ;;  %v153_v56 = vmul.f32 %v147_v42, %v144_v39 }
  0x46   :  { %v151_v46 = vadd.f32 1e-05, %v148_v43  ;;  %219 = vrcp.f32 %v149_v44  ;;  %v154_v59 = vmul.f32 %v148_v43, %v145_v40 }
  0x47   :  { %221 = vrcp.f32 %v150_v45 }
  0x48   :  { %223 = vrcp.f32 %v151_v46 }
  0x4c   :  { %v220_v47 = vpop.eup %219 }
  0x4d   :  { %v222_v49 = vpop.eup %221  ;;  %v158_v50 = vmul.f32 %v220_v47, %v149_v44 }
  0x4e   :  { %v224_v51 = vpop.eup %223  ;;  %v159_v52 = vmul.f32 %v222_v49, %v150_v45 }
  0x4f   :  { %v160_v54 = vmul.f32 %v224_v51, %v151_v46  ;;  %v161_v55 = vsub.f32 2.0, %v158_v50 }
  0x50   :  { %v162_v57 = vsub.f32 2.0, %v159_v52 }
  0x51   :  { %v163_v60 = vsub.f32 2.0, %v160_v54  ;;  %v164_v61 = vmul.f32 %v220_v47, %v161_v55 }
  0x52   :  { %v165_v62 = vmul.f32 %v222_v49, %v162_v57 }
  0x53   :  { %v166_v63 = vmul.f32 %v224_v51, %v163_v60  ;;  %v167_v0 = vmul.f32 %v164_v61, %v152_v53 }
  0x54   :  { %v168_v1 = vmul.f32 %v165_v62, %v153_v56 }
  0x55   :  { %v169_v2 = vmul.f32 %v166_v63, %v154_v59 }
  0x56   :  { %v183_v27 = vadd.f32 %v168_v1, %v167_v0 }
  0x57   :  { %v179_v3 = vsel %vm176_vm4, %v169_v2, 0.0 }
  0x58   :  { %v184_v4 = vadd.f32 %v183_v27, %v179_v3 }
  0x5a   :  { %185 = vst [vmem:[#allocation7] sm:$0x1] %v184_v4 }
  0x5b   :  { %196 = dma.vmem_to_hbm [thread:$0]  %s192_s1, 16, %s194_s21, [#allocation4]  }
  0x5c   :  { %301 = dma.done.wait [#allocation4], 16  }
  0x5d   :  { %302 = vsyncadd [#allocation4], 4294967280 }
  0x5e   :  { %201 = vsyncpa [#allocation3], 1 }
  0x5f   :  { %202 = vsyncpa [#allocation6], 1 }
  0x60   :  { %203 = vsyncpa [#allocation4], 1 }

</bundles_post_ra>
